<compile_context>
chip_gen: v7x
topology: tpu7x:2x2x1
jax: 0.10.0
libtpu: 0.0.40
codegen_flags: <defaults>
</compile_context>

<pallas_src>
import jax
import jax.numpy as jnp
from jax.experimental import pallas as pl
from jax.experimental.pallas import tpu as pltpu


B_TILE = 8  # graphs processed per grid step (graphs sit on the sublane axis)


def _sagpool_kernel(x_ref, w1_ref, b1_ref, w2_ref, out_ref):
    # x_ref : (N, B_TILE, F_in)  node features, graphs on the sublane axis
    # w1_ref: (F_in, F_out)      fc1 weight (pre-transposed)
    # b1_ref: (1, F_out)         fc1 bias
    # w2_ref: (1, F_out)         fc2 weight stored as a row (fc2 bias cancels -> dropped)
    # out_ref: (B_TILE, F_in)
    x = x_ref[...]
    if x.dtype != jnp.float32:                 # single upcast; keep compute in f32 everywhere
        x = x.astype(jnp.float32)
    n, bt, f_in = x.shape

    # --- fc1 + tanh: one flattened MXU matmul shared across the whole graph tile --------
    x2 = x.reshape(n * bt, f_in)               # layout-preserving (minor dim untouched)
    h = jnp.dot(x2, w1_ref[...], preferred_element_type=jnp.float32)
    h = jnp.tanh(h + b1_ref[...])              # (n*bt, F_out)

    # --- fc2 score: VPU multiply + lane reduce (avoids a width-1 MXU matmul) ------------
    s = jnp.sum(h * w2_ref[...], axis=-1, keepdims=True)            # (n*bt, 1)
    s = s.reshape(n, bt, 1)                                         # layout-preserving

    # --- per-graph attention: exp(s)/sum(exp(s)); max-subtraction for f32 overflow safety
    m = jnp.max(s, axis=0, keepdims=True)                           # (1, bt, 1)  leading-dim max
    e = jnp.exp(s - m)                                              # (n, bt, 1)
    denom = jnp.sum(e, axis=0)                                      # (bt, 1)     leading-dim sum

    # --- output = attention @ x as broadcast mul + node-axis reduce ----------------------
    weighted = jnp.sum(e * x, axis=0)                               # (bt, F_in)
    inv_denom = pl.reciprocal(denom, approx=False)                  # exact: approx drifts past 1e-5
    out_ref[...] = jnp.tanh(weighted * inv_denom).astype(out_ref.dtype)


def sagpool_forward_batched(x, w1, b1, w2):
    """Batched SAGPool forward. x: (B, N, F_in) -> (B, F_in)."""
    b, n, f_in = x.shape
    f_out = w1.shape[1]

    b_pad = ((b + B_TILE - 1) // B_TILE) * B_TILE
    if b_pad != b:
        x = jnp.pad(x, ((0, b_pad - b), (0, 0), (0, 0)))   # zero graphs are NaN-safe
    xt = jnp.transpose(x, (1, 0, 2))                        # (N, B_pad, F_in): graphs -> sublanes

    out = pl.pallas_call(
        _sagpool_kernel,
        out_shape=jax.ShapeDtypeStruct((b_pad, f_in), x.dtype),
        grid_spec=pltpu.PrefetchScalarGridSpec(
            num_scalar_prefetch=0,
            grid=(b_pad // B_TILE,),
            in_specs=[
                pl.BlockSpec((n, B_TILE, f_in), lambda i: (0, i, 0)),
                pl.BlockSpec((f_in, f_out), lambda i: (0, 0)),
                pl.BlockSpec((1, f_out), lambda i: (0, 0)),
                pl.BlockSpec((1, f_out), lambda i: (0, 0)),
            ],
            out_specs=pl.BlockSpec((B_TILE, f_in), lambda i: (i, 0)),
        ),
        compiler_params=pltpu.CompilerParams(
            # Batch axis is independent across graphs: lets v7x shard it over its 2 TCs.
            dimension_semantics=("parallel",),
        ),
    )(xt, w1, b1, w2)
    return out[:b]


def sagpool_forward(x, w1, b1, w2, b2=None):
    """Single-graph forward matching torch SAGPool.forward: x (N, F_in) -> (F_in,).

    b2 is accepted for module parity but unused: it cancels in exp(s+b2)/sum(exp(s+b2)).
    """
    del b2
    return sagpool_forward_batched(x[None], w1, b1, w2)[0]


def init_params(key, in_features, out_features):
    # Deterministic PyTorch-style Linear init: U(-1/sqrt(fan_in), 1/sqrt(fan_in)).
    # Weights stored pre-transposed: w1 (F_in, F_out), w2 as a (1, F_out) row.
    k1, k2, k3, k4 = jax.random.split(key, 4)
    bound1 = 1.0 / jnp.sqrt(in_features)
    bound2 = 1.0 / jnp.sqrt(out_features)
    w1 = jax.random.uniform(k1, (in_features, out_features), jnp.float32, -bound1, bound1)
    b1 = jax.random.uniform(k2, (1, out_features), jnp.float32, -bound1, bound1)
    w2 = jax.random.uniform(k3, (1, out_features), jnp.float32, -bound2, bound2)
    b2 = jax.random.uniform(k4, (1, 1), jnp.float32, -bound2, bound2)
    return w1, b1, w2, b2


if __name__ == "__main__":
    num_graphs = 32
    num_nodes = 8
    in_features = 16
    out_features = 32

    key = jax.random.PRNGKey(0)
    kx, kp = jax.random.split(key)
    x = jax.random.normal(kx, (num_graphs, num_nodes, in_features), jnp.float32)
    w1, b1, w2, b2 = init_params(kp, in_features, out_features)

    out = sagpool_forward_batched(x, w1, b1, w2)
    jax.block_until_ready(out)

    # Pure-JAX reference of the exact torch math (including b2, which cancels in the softmax).
    h_ref = jnp.tanh(jnp.einsum("bnf,fo->bno", x, w1) + b1)
    s_ref = jnp.einsum("bno,o->bn", h_ref, w2[0]) + b2[0, 0]
    att_ref = jnp.exp(s_ref)
    att_ref = att_ref / jnp.sum(att_ref, axis=-1, keepdims=True)
    out_ref = jnp.tanh(jnp.einsum("bn,bnf->bf", att_ref, x))

    assert out.shape == (num_graphs, in_features)
    assert jnp.allclose(out, out_ref, atol=1e-5, rtol=1e-5), float(jnp.max(jnp.abs(out - out_ref)))

    # Single-graph path (matches the torch module's (F_in,) output shape).
    out_single = sagpool_forward(x[0], w1, b1, w2, b2)
    jax.block_until_ready(out_single)
    assert out_single.shape == (in_features,)
    assert jnp.allclose(out_single, out_ref[0], atol=1e-5, rtol=1e-5)

    print("KERNEL_OK")
</pallas_src>

<mosaic_0001>
module attributes {stable_mosaic.version = 11 : i64} {
  func.func @_sagpool_kernel(%arg0: i32, %arg1: memref<8x8x16xf32, #tpu.memory_space<vmem>>, %arg2: memref<16x32xf32, #tpu.memory_space<vmem>>, %arg3: memref<1x32xf32, #tpu.memory_space<vmem>>, %arg4: memref<1x32xf32, #tpu.memory_space<vmem>>, %arg5: memref<8x16xf32, #tpu.memory_space<vmem>>) attributes {dimension_semantics = [#tpu.dimension_semantics<parallel>], iteration_bounds = array<i64: 4>, scalar_prefetch = 0 : i64, scratch_operands = 0 : i64, tpu.core_type = #tpu.core_type<tc>, window_params = [{transform_indices = @transform_0, window_bounds = array<i64: 8, 8, 16>}, {pipeline_mode = #tpu.pipeline_mode<synchronous>, transform_indices = @transform_1, window_bounds = array<i64: 16, 32>}, {pipeline_mode = #tpu.pipeline_mode<synchronous>, transform_indices = @transform_2, window_bounds = array<i64: 1, 32>}, {pipeline_mode = #tpu.pipeline_mode<synchronous>, transform_indices = @transform_3, window_bounds = array<i64: 1, 32>}, {transform_indices = @transform_4, window_bounds = array<i64: 8, 16>}]} {
    %c0 = arith.constant 0 : index
    %c0_0 = arith.constant 0 : index
    %c0_1 = arith.constant 0 : index
    %0 = vector.load %arg1[%c0, %c0_0, %c0_1] : memref<8x8x16xf32, #tpu.memory_space<vmem>>, vector<8x8x16xf32>
    %1 = vector.shape_cast %0 : vector<8x8x16xf32> to vector<64x16xf32>
    %c0_2 = arith.constant 0 : index
    %c0_3 = arith.constant 0 : index
    %2 = vector.load %arg2[%c0_2, %c0_3] : memref<16x32xf32, #tpu.memory_space<vmem>>, vector<16x32xf32>
    %cst = arith.constant dense<0.000000e+00> : vector<64x32xf32>
    %3 = tpu.matmul %1, %2, %cst {dimension_numbers = #tpu.dot_dimension_numbers<[1], [0], [0], [1], [0, 0, 1, 1], [], []>} : vector<64x16xf32>, vector<16x32xf32>, vector<64x32xf32> -> vector<64x32xf32>
    %c0_4 = arith.constant 0 : index
    %c0_5 = arith.constant 0 : index
    %4 = vector.load %arg3[%c0_4, %c0_5] : memref<1x32xf32, #tpu.memory_space<vmem>>, vector<1x32xf32>
    %5 = vector.broadcast %4 : vector<1x32xf32> to vector<64x32xf32>
    %6 = arith.addf %3, %5 : vector<64x32xf32>
    %7 = math.tanh %6 : vector<64x32xf32>
    %c0_6 = arith.constant 0 : index
    %c0_7 = arith.constant 0 : index
    %8 = vector.load %arg4[%c0_6, %c0_7] : memref<1x32xf32, #tpu.memory_space<vmem>>, vector<1x32xf32>
    %9 = vector.broadcast %8 : vector<1x32xf32> to vector<64x32xf32>
    %10 = arith.mulf %7, %9 : vector<64x32xf32>
    %cst_8 = arith.constant dense<0.000000e+00> : vector<64xf32>
    %11 = vector.multi_reduction <add>, %10, %cst_8 [1] : vector<64x32xf32> to vector<64xf32>
    %12 = vector.shape_cast %11 : vector<64xf32> to vector<64x1xf32>
    %13 = vector.shape_cast %12 : vector<64x1xf32> to vector<8x8x1xf32>
    %cst_9 = arith.constant dense<0xFF800000> : vector<8x1xf32>
    %14 = vector.multi_reduction <maximumf>, %13, %cst_9 [0] : vector<8x8x1xf32> to vector<8x1xf32>
    %15 = vector.shape_cast %14 : vector<8x1xf32> to vector<1x8x1xf32>
    %16 = vector.broadcast %15 : vector<1x8x1xf32> to vector<8x8x1xf32>
    %17 = arith.subf %13, %16 : vector<8x8x1xf32>
    %18 = math.exp %17 : vector<8x8x1xf32>
    %cst_10 = arith.constant dense<0.000000e+00> : vector<8x1xf32>
    %19 = vector.multi_reduction <add>, %18, %cst_10 [0] : vector<8x8x1xf32> to vector<8x1xf32>
    %20 = vector.broadcast %18 : vector<8x8x1xf32> to vector<8x8x16xf32>
    %21 = arith.mulf %20, %0 : vector<8x8x16xf32>
    %cst_11 = arith.constant dense<0.000000e+00> : vector<8x16xf32>
    %22 = vector.multi_reduction <add>, %21, %cst_11 [0] : vector<8x8x16xf32> to vector<8x16xf32>
    %23 = tpu.reciprocal %19 : vector<8x1xf32> -> vector<8x1xf32>
    %24 = vector.broadcast %23 : vector<8x1xf32> to vector<8x16xf32>
    %25 = arith.mulf %22, %24 : vector<8x16xf32>
    %26 = math.tanh %25 : vector<8x16xf32>
    %c0_12 = arith.constant 0 : index
    %c0_13 = arith.constant 0 : index
    %27 = vector.load %arg5[%c0_12, %c0_13] : memref<8x16xf32, #tpu.memory_space<vmem>>, vector<8x16xf32>
    tpu.vector_store %arg5[%c0_12, %c0_13], %26 {strides = array<i32>} : memref<8x16xf32, #tpu.memory_space<vmem>>, vector<8x16xf32>,
    return
  }
  func.func @transform_0(%arg0: i32) -> (i32, i32, i32) {
    %c0_i32 = arith.constant 0 : i32
    %c0_i32_0 = arith.constant 0 : i32
    %c0_i32_1 = arith.constant 0 : i32
    return %c0_i32, %arg0, %c0_i32_0 : i32, i32, i32
  }
  func.func @transform_1(%arg0: i32) -> (i32, i32) {
    %c0_i32 = arith.constant 0 : i32
    %c0_i32_0 = arith.constant 0 : i32
    %c0_i32_1 = arith.constant 0 : i32
    return %c0_i32, %c0_i32_0 : i32, i32
  }
  func.func @transform_2(%arg0: i32) -> (i32, i32) {
    %c0_i32 = arith.constant 0 : i32
    %c0_i32_0 = arith.constant 0 : i32
    %c0_i32_1 = arith.constant 0 : i32
    return %c0_i32, %c0_i32_0 : i32, i32
  }
  func.func @transform_3(%arg0: i32) -> (i32, i32) {
    %c0_i32 = arith.constant 0 : i32
    %c0_i32_0 = arith.constant 0 : i32
    %c0_i32_1 = arith.constant 0 : i32
    return %c0_i32, %c0_i32_0 : i32, i32
  }
  func.func @transform_4(%arg0: i32) -> (i32, i32) {
    %c0_i32 = arith.constant 0 : i32
    %c0_i32_0 = arith.constant 0 : i32
    return %arg0, %c0_i32 : i32, i32
  }
}

</mosaic_0001>

<bundles_post_ra>
// kernel: tpu_custom_call.1
= control target key start
LH: loop header
LB: loop body
LE: loop exit
PB: predicated region body
PF: predicated region fallthrough
CT: control target
= control target key end

     0   :  { %s739_s15 = smov 0   ;;  %s741_s16 = smov 0   ;;  %s862_s0 = inlined_call_operand.vmem [shape: f32[8,32,16], index: 0, kind: input, shape index: {}]   ;;  %s863_s1 = inlined_call_operand.vmem [shape: f32[16,32], index: 1, kind: input, shape index: {}]   ;;  %s864_s2 = inlined_call_operand.vmem [shape: f32[1,32], index: 2, kind: input, shape index: {}]   ;;  %s865_s3 = inlined_call_operand.vmem [shape: f32[1,32], index: 3, kind: input, shape index: {}]   ;;  %s866_s4 = inlined_call_operand.vmem [shape: f32[32,16], index: 4, kind: output, shape index: {}]  }
   0x1   :  { %s743_s17 = smov 0  }
   0x2 LB: > { %s577_s18 = sadd.s32 4294967295, %s712_s17   ;;  %s756_s19 = sadd.s32 1, %s712_s17   ;;  %s712_s17 = sphi %s743_s17, %s869_s17   ;;  %s708_s16 = sphi %s741_s16, %s868_s16   ;;  %s704_s15 = sphi %s739_s15, %s867_s15  }
   0x3   : > { %s18_s20 = ssub.s32 %s712_s17, %s756_s19  ;;  %s21_s21 = sadd.s32 1, %s708_s16 }
   0x4   : > { %p19_p0 = scmp.eq.s32.totalorder %s18_s20, 0  ;;  %p28_p1 = scmp.ne.s32.totalorder %s708_s16, %s704_s15 }
   0x5   : > { %p29_p2 = scmp.eq.s32.totalorder %s712_s17, 0  ;;  %p580_p4 = scmp.ge.s32.totalorder %s712_s17, 4 }
   0x6   : > { %s765_s22 = scalar_select %p19_p0, %s708_s16, %s21_s21  }
   0x7   : > { %p30_p3 = por %p29_p2, %p28_p1  ;;  %152 = sbr.rel (%p580_p4) target bundleno = 26 (0x1a), region = 28 }
   0xe   : > { %155 = sbr.rel (!%p30_p3) target bundleno = 26 (0x1a), region = 32  ;;  %s157_s23 = sand.u32 (%p30_p3), 1, %s708_s16  }
   0xf   : > { %s582_s24 = sshll.u32 (%p30_p3), %s712_s17, 3  ;;  %s581_s25 = sshll.u32 (%p30_p3), %s157_s23, 6 }
  0x10   : > { %s161_s28 = scalar_lea.vmem (%p30_p3), %s862_s0, %s582_s24  ;;  %s159_s29 = scalar_lea.vmem (%p30_p3), [#allocation2], %s581_s25 }
  0x11   : > { %v203_v0 = vld [vmem:[%s161_s28] sm:$0xff] (%p30_p3) }
  0x12   : > { %v205_v1 = vld [vmem:[%s161_s28 + $0x20] sm:$0xff] (%p30_p3)  ;;  %204 = vst [vmem:[%s159_s29] sm:$0xff] (%p30_p3), %v203_v0 }
  0x13   : > { %v207_v2 = vld [vmem:[%s161_s28 + $0x40] sm:$0xff] (%p30_p3)  ;;  %206 = vst [vmem:[%s159_s29 + $0x8] sm:$0xff] (%p30_p3), %v205_v1 }
  0x14   : > { %208 = vst [vmem:[%s159_s29 + $0x10] sm:$0xff] (%p30_p3), %v207_v2  ;;  %v209_v3 = vld [vmem:[%s161_s28 + $0x60] sm:$0xff] (%p30_p3) }
  0x15   : > { %v211_v4 = vld [vmem:[%s161_s28 + $0x80] sm:$0xff]  ;;  %210 = vst [vmem:[%s159_s29 + $0x18] sm:$0xff] %v209_v3 }
  0x16   : > { %v213_v5 = vld [vmem:[%s161_s28 + $0xa0] sm:$0xff]  ;;  %212 = vst [vmem:[%s159_s29 + $0x20] sm:$0xff] %v211_v4 }
  0x17   : > { %214 = vst [vmem:[%s159_s29 + $0x28] sm:$0xff] %v213_v5  ;;  %v215_v6 = vld [vmem:[%s161_s28 + $0xc0] sm:$0xff] }
  0x18   : > { %v217_v7 = vld [vmem:[%s161_s28 + $0xe0] sm:$0xff]  ;;  %216 = vst [vmem:[%s159_s29 + $0x30] sm:$0xff] %v215_v6 }
  0x19   : > { %218 = vst [vmem:[%s159_s29 + $0x38] sm:$0xff] %v217_v7 }
  0x1a PF: > { %p583_p5 = scmp.ge.s32.totalorder %s712_s17, 1  ;;  %p223_p6 = scmp.lt.s32.totalorder %s712_s17, 5 }
  0x1c   : > { %p224_p7 = pnand %p583_p5, %p223_p6 }
  0x1d   : > { %v266_v8 = vld [vmem:[%s863_s1] sm:$0xff] (!%p224_p7)  ;;  %v267_v9 = vld [vmem:[%s863_s1 + $0x8] sm:$0xff] (!%p224_p7)  ;;  %s230_s8 = sand.u32 (!%p224_p7), 1, %s704_s15   ;;  %vm275_vm0 = vcmask (!%p224_p7), 130048   ;;  %vm428_vm1 = vcmask (!%p224_p7), 261120   ;;  %p254_p8 = scmp.lt.s32.totalorder (!%p224_p7), %s577_s18, 3 }
  0x1e   : > { %227 = sbr.rel (%p224_p7) target bundleno = 480 (0x1e0), region = 70  ;;  %v624_v10 = vpack.c.bf16 (!%p224_p7), %v267_v9, %v266_v8  ;;  %s584_s9 = sshll.u32 (!%p224_p7), %s230_s8, 6  ;;  %v586_v19 = vld [vmem:[%s864_s2] ss:$0 sm:$0xff] (!%p224_p7) }
  0x1f   : > { %s232_s10 = scalar_lea.vmem (!%p224_p7), [#allocation2], %s584_s9  ;;  %v595_v36 = vld [vmem:[%s865_s3] ss:$0 sm:$0xff] (!%p224_p7) }
  0x20   : > { %625 = vmatprep.subr.bf16.mxu0 (!%p224_p7), %v624_v10  ;;  %628 = vmatprep.subr.bf16.mxu1 (!%p224_p7), %v624_v10  ;;  %v782_v11 = vld [vmem:[%s232_s10] sm:$0xff] (!%p224_p7)  ;;  %v786_v13 = vld [vmem:[%s232_s10 + $0x8] sm:$0xff] (!%p224_p7)  ;;  %v794_v15 = vld [vmem:[%s232_s10 + $0x10] sm:$0xff] (!%p224_p7) }
  0x21   : > { %v784_v12 = vld [vmem:[%s232_s10 + $0x20] sm:$0xff] (!%p224_p7)  ;;  %627 = vmatpush3.bf16.msra.mxu0 (!%p224_p7), %v624_v10  ;;  %629 = vmatpush3.bf16.msra.mxu1 (!%p224_p7), %v624_v10  ;;  %v788_v14 = vld [vmem:[%s232_s10 + $0x28] sm:$0xff] (!%p224_p7)  ;;  %v796_v16 = vld [vmem:[%s232_s10 + $0x30] sm:$0xff] (!%p224_p7) }
  0x22   : > { %612 = vmatprep.mubr.msk.f32.mxu0 (!%p224_p7), %vm275_vm0, %v782_v11  ;;  %618 = vmatprep.mubr.msk.f32.mxu1 (!%p224_p7), %vm275_vm0, %v784_v12  ;;  %v804_v17 = vld [vmem:[%s232_s10 + $0x18] sm:$0xff] (!%p224_p7) }
  0x23   : > { %v808_v18 = vld [vmem:[%s232_s10 + $0x38] sm:$0xff] (!%p224_p7) }
  0x24   : > { %613 = vmatmul.mubr.msk.f32.vlgmr.msra.gmra.mrb[0].mxu0 (!%p224_p7), %vm275_vm0, %v786_v13  ;;  %619 = vmatmul.mubr.msk.f32.vlgmr.msra.gmra.mrb[0].mxu1 (!%p224_p7), %vm275_vm0, %v788_v14 }
  0x25   : > { %615 = vmatprep.mubr.msk.f32.mxu0 %vm275_vm0, %v794_v15  ;;  %621 = vmatprep.mubr.msk.f32.mxu1 %vm275_vm0, %v796_v16  ;;  %s871_s18 = smov (!%p254_p8, %s577_s18), 3 }
  0x26   : > { %s585_s15 = sshll.u32 %s871_s18, 3 }
  0x27   : > { %s257_s23 = scalar_lea.vmem %s866_s4, %s585_s15 }
  0x28   : > { %616 = vmatmul.mubr.msk.f32.gmra.mrb[2].mxu0 %vm275_vm0, %v804_v17  ;;  %622 = vmatmul.mubr.msk.f32.gmra.mrb[2].mxu1 %vm275_vm0, %v808_v18 }
  0xf7   : > { %v614_v20 = vpop.f32.mrb[0].mxu0  ;;  %v620_v21 = vpop.f32.mrb[0].mxu1 }
  0xf8   : > { %v372_v22 = vadd.f32 %v614_v20, %v586_v19  ;;  %v392_v23 = vadd.f32 %v620_v21, %v586_v19  ;;  %v366_v24 = vpop.f32.mrb[1].mxu0  ;;  %v386_v25 = vpop.f32.mrb[1].mxu1 }
  0xf9   : > { %v367_v26 = vadd.f32 %v586_v19, %v366_v24  ;;  %v387_v27 = vadd.f32 %v586_v19, %v386_v25 }
  0xfa   : > { %654 = vtanh.f32 %v372_v22 }
  0xfb   : > { %656 = vtanh.f32 %v392_v23  ;;  %v617_v28 = vpop.f32.mrb[2].mxu0  ;;  %v623_v29 = vpop.f32.mrb[2].mxu1 }
  0xfc   : > { %658 = vtanh.f32 %v367_v26  ;;  %v382_v30 = vadd.f32 %v617_v28, %v586_v19  ;;  %v376_v31 = vpop.f32.mrb[3].mxu0  ;;  %v402_v32 = vadd.f32 %v623_v29, %v586_v19  ;;  %v396_v33 = vpop.f32.mrb[3].mxu1 }
  0xfd   : > { %660 = vtanh.f32 %v387_v27  ;;  %v377_v34 = vadd.f32 %v586_v19, %v376_v31  ;;  %v397_v35 = vadd.f32 %v586_v19, %v396_v33 }
  0xfe   : > { %662 = vtanh.f32 %v382_v30 }
  0xff   : > { %664 = vtanh.f32 %v377_v34 }
 0x100   : > { %666 = vtanh.f32 %v402_v32 }
 0x101   : > { %668 = vtanh.f32 %v397_v35 }
 0x104   : > { %v655_v37 = vpop.eup %654 }
 0x105   : > { %v657_v38 = vpop.eup %656  ;;  %v421_v39 = vmul.f32 %v655_v37, %v595_v36 }
 0x106   : > { %v659_v40 = vpop.eup %658  ;;  %v425_v41 = vmul.f32 %v657_v38, %v595_v36 }
 0x107   : > { %v661_v42 = vpop.eup %660  ;;  %v432_v43 = vsel %vm428_vm1, %v421_v39, 0.0  ;;  %v420_v44 = vmul.f32 %v659_v40, %v595_v36 }
 0x108   : > { %v663_v45 = vpop.eup %662  ;;  %v444_v46 = vsel %vm428_vm1, %v425_v41, 0.0  ;;  %433 = vadd.xlane.f32.xlu0 %v432_v43  ;;  %v424_v53 = vmul.f32 %v661_v42, %v595_v36 }
 0x109   : > { %v665_v47 = vpop.eup %664  ;;  %445 = vadd.xlane.f32.xlu1 %v444_v46  ;;  %v423_v48 = vmul.f32 %v663_v45, %v595_v36  ;;  %v429_v52 = vsel %vm428_vm1, %v420_v44, 0.0 }
 0x10a   : > { %v667_v49 = vpop.eup %666  ;;  %v422_v54 = vmul.f32 %v665_v47, %v595_v36  ;;  %v441_v57 = vsel %vm428_vm1, %v424_v53, 0.0 }
 0x10b   : > { %v669_v50 = vpop.eup %668  ;;  %v438_v51 = vsel %vm428_vm1, %v423_v48, 0.0  ;;  %v427_v56 = vmul.f32 %v667_v49, %v595_v36 }
 0x10c   : > { %430 = vadd.xlane.f32.xlu0 %v429_v52  ;;  %v426_v55 = vmul.f32 %v669_v50, %v595_v36  ;;  %v435_v58 = vsel %vm428_vm1, %v422_v54, 0.0 }
 0x10d   : > { %439 = vadd.xlane.f32.xlu1 %v438_v51  ;;  %v450_v60 = vsel %vm428_vm1, %v427_v56, 0.0 }
 0x10e   : > { %v447_v59 = vsel %vm428_vm1, %v426_v55, 0.0 }
 0x110   : > { %442 = vadd.xlane.f32.xlu0 %v441_v57 }
 0x111   : > { %436 = vadd.xlane.f32.xlu1 %v435_v58 }
 0x114   : > { %448 = vadd.xlane.f32.xlu0 %v447_v59 }
 0x115   : > { %451 = vadd.xlane.f32.xlu1 %v450_v60 }
 0x195   : > { %v434_v61 = vpop.xlane.xlu0 %433 }
 0x196   : > { %v446_v62 = vpop.xlane.xlu1 %445 }
 0x197   : > { %v454_v7 = vmax.f32 %v434_v61, %v446_v62 }
 0x199   : > { %v431_v63 = vpop.xlane.xlu0 %430 }
 0x19a   : > { %v440_v0 = vpop.xlane.xlu1 %439 }
 0x19d   : > { %v443_v1 = vpop.xlane.xlu0 %442 }
 0x19e   : > { %v437_v2 = vpop.xlane.xlu1 %436  ;;  %v453_v3 = vmax.f32 %v431_v63, %v443_v1 }
 0x1a0   : > { %v457_v9 = vmax.f32 %v453_v3, %v454_v7 }
 0x1a1   : > { %v449_v4 = vpop.xlane.xlu0 %448 }
 0x1a2   : > { %v452_v5 = vpop.xlane.xlu1 %451  ;;  %v455_v6 = vmax.f32 %v437_v2, %v449_v4 }
 0x1a3   : > { %v456_v8 = vmax.f32 %v440_v0, %v452_v5 }
 0x1a5   : > { %v458_v10 = vmax.f32 %v455_v6, %v456_v8 }
 0x1a7   : > { %v459_v19 = vmax.f32 %v457_v9, %v458_v10 }
 0x1a9   : > { %v460_v20 = vsub.f32 %v431_v63, %v459_v19  ;;  %v461_v21 = vsub.f32 %v434_v61, %v459_v19  ;;  %v462_v22 = vsub.f32 %v437_v2, %v459_v19  ;;  %v463_v23 = vsub.f32 %v440_v0, %v459_v19 }
 0x1aa   : > { %v464_v24 = vsub.f32 %v443_v1, %v459_v19  ;;  %v465_v29 = vsub.f32 %v446_v62, %v459_v19  ;;  %v466_v31 = vsub.f32 %v449_v4, %v459_v19  ;;  %v467_v32 = vsub.f32 %v452_v5, %v459_v19 }
 0x1ab   : > { %v468_v25 = vmul.f32 1.442695, %v460_v20  ;;  %v470_v26 = vmul.f32 1.442695, %v461_v21  ;;  %v472_v27 = vmul.f32 1.442695, %v462_v22 }
 0x1ac   : > { %v474_v28 = vmul.f32 1.442695, %v463_v23  ;;  %v476_v30 = vmul.f32 1.442695, %v464_v24  ;;  %v478_v33 = vmul.f32 1.442695, %v465_v29 }
 0x1ad   : > { %670 = vpow2.f32 %v468_v25  ;;  %v480_v34 = vmul.f32 1.442695, %v466_v31  ;;  %v482_v35 = vmul.f32 1.442695, %v467_v32 }
 0x1ae   : > { %672 = vpow2.f32 %v470_v26 }
 0x1af   : > { %674 = vpow2.f32 %v472_v27 }
 0x1b0   : > { %676 = vpow2.f32 %v474_v28 }
 0x1b1   : > { %678 = vpow2.f32 %v476_v30 }
 0x1b2   : > { %680 = vpow2.f32 %v478_v33 }
 0x1b3   : > { %682 = vpow2.f32 %v480_v34 }
 0x1b4   : > { %684 = vpow2.f32 %v482_v35 }
 0x1b7   : > { %v671_v36 = vpop.eup %670 }
 0x1b8   : > { %v673_v37 = vpop.eup %672  ;;  %v491_v38 = vmul.f32 %v671_v36, %v782_v11 }
 0x1b9   : > { %v675_v39 = vpop.eup %674  ;;  %v484_v40 = vadd.f32 %v673_v37, %v671_v36  ;;  %v492_v41 = vmul.f32 %v673_v37, %v786_v13 }
 0x1ba   : > { %v677_v42 = vpop.eup %676  ;;  %v493_v43 = vmul.f32 %v675_v39, %v794_v15  ;;  %v499_v44 = vsel %vm275_vm0, %v491_v38, 0.0 }
 0x1bb   : > { %v485_v45 = vadd.f32 %v675_v39, %v484_v40  ;;  %v494_v46 = vmul.f32 %v677_v42, %v804_v17  ;;  %v500_v47 = vsel %vm275_vm0, %v492_v41, 0.0  ;;  %v679_v48 = vpop.eup %678 }
 0x1bc   : > { %v501_v49 = vadd.f32 %v500_v47, %v499_v44  ;;  %v502_v11 = vsel %vm275_vm0, %v493_v43, 0.0  ;;  %v495_v13 = vmul.f32 %v679_v48, %v784_v12  ;;  %v681_v54 = vpop.eup %680 }
 0x1bd   : > { %v486_v50 = vadd.f32 %v677_v42, %v485_v45  ;;  %v504_v53 = vsel %vm275_vm0, %v494_v46, 0.0  ;;  %v683_v56 = vpop.eup %682  ;;  %v496_v17 = vmul.f32 %v681_v54, %v788_v14 }
 0x1be   : > { %v503_v51 = vadd.f32 %v502_v11, %v501_v49  ;;  %v506_v58 = vsel %vm275_vm0, %v495_v13, 0.0  ;;  %v685_v59 = vpop.eup %684  ;;  %v497_v62 = vmul.f32 %v683_v56, %v796_v16 }
 0x1bf   : > { %v487_v52 = vadd.f32 %v679_v48, %v486_v50  ;;  %v508_v12 = vsel %vm275_vm0, %v496_v17, 0.0  ;;  %v498_v0 = vmul.f32 %v685_v59, %v808_v18 }
 0x1c0   : > { %v505_v15 = vadd.f32 %v504_v53, %v503_v51  ;;  %v510_v1 = vsel %vm275_vm0, %v497_v62, 0.0 }
 0x1c1   : > { %v488_v55 = vadd.f32 %v681_v54, %v487_v52  ;;  %v512_v3 = vsel %vm275_vm0, %v498_v0, 0.0 }
 0x1c2   : > { %v507_v60 = vadd.f32 %v506_v58, %v505_v15 }
 0x1c3   : > { %v489_v57 = vadd.f32 %v683_v56, %v488_v55 }
 0x1c4   : > { %v509_v63 = vadd.f32 %v508_v12, %v507_v60 }
 0x1c5   : > { %v490_v61 = vadd.f32 %v685_v59, %v489_v57 }
 0x1c6   : > { %v511_v2 = vadd.f32 %v510_v1, %v509_v63 }
 0x1c7   : > { %686 = vrcp.f32 %v490_v61 }
 0x1c8   : > { %v513_v14 = vadd.f32 %v512_v3, %v511_v2 }
 0x1d1   : > { %v687_v4 = vpop.eup %686 }
 0x1d2   : > { %v515_v5 = vmul.f32 %v687_v4, %v513_v14 }
 0x1d4   : > { %688 = vtanh.f32 %v515_v5 }
 0x1de   : > { %v689_v16 = vpop.eup %688 }
 0x1df   : > { %517 = vst.msk [vmem:[%s257_s23] sm:$0xff] %vm275_vm0, %v689_v16 }
 0x1e0 PF: > { %p11_p9 = scmp.ge.s32.totalorder %s756_s19, 6   ;;  %s867_s15 = smov %s708_s16 }
 0x1e1   : > { %s868_s16 = smov %s765_s22  ;;  %s869_s17 = smov %s756_s19 }
 0x1e2   :  { %13 = sbr.rel (!%p11_p9) target bundleno = 2 (0x2), region = 109 }

</bundles_post_ra>
